<compile_context>
chip_gen: v6e
topology: v6e:2x2x1
jax: 0.10.0
libtpu: 0.0.40
codegen_flags: <defaults>
</compile_context>

<pallas_src>
import functools

import jax
import jax.numpy as jnp
from jax.experimental import pallas as pl
from jax.experimental.pallas import tpu as pltpu


def _eca_kernel(x_ref, w_ref, o_ref, *, C, k, inv_hw):
    """x_ref/o_ref: (B*C, HW) in VMEM. w_ref: (2, k) Conv1d taps in SMEM."""
    bc = x_ref.shape[0]
    pad = (k - 1) // 2

    x = x_ref[...].astype(jnp.float32)                         # (B*C, HW)
    avg = jnp.sum(x, axis=-1, keepdims=True) * inv_hw          # (B*C, 1) global average pool
    mx = jnp.max(x, axis=-1, keepdims=True)                    # (B*C, 1) global max pool

    # Channel index of each row (rows are laid out as b*C + c).
    c_idx = jax.lax.broadcasted_iota(jnp.int32, (bc, 1), 0) % C

    # Conv1d(2 -> 1, k, padding=(k-1)//2, bias=False) along the channel axis:
    #   y[b, c] = sum_j w[0, j] * avg[b, c + j - pad] + w[1, j] * max[b, c + j - pad]
    # implemented as k masked roll+MAC steps (VPU/XLU only, no MXU, no dense (C,C) weights).
    y = jnp.zeros((bc, 1), jnp.float32)
    for j in range(k):                                         # static unroll, k is tiny
        d = j - pad                                            # tap offset along channels
        w_a = w_ref[0, j]
        w_m = w_ref[1, j]
        if d == 0:
            y = y + w_a * avg + w_m * mx
        else:
            # rolled[r] = pooled[(r + d) mod (B*C)]; wrapped / cross-batch rows are masked out.
            shift = (-d) % bc
            sa = pltpu.roll(avg, shift, axis=0)
            sm = pltpu.roll(mx, shift, axis=0)
            valid = (c_idx + d >= 0) & (c_idx + d < C)         # zero padding + batch isolation
            y = y + jnp.where(valid, w_a * sa + w_m * sm, 0.0)

    gate = jax.nn.sigmoid(y)                                   # (B*C, 1), kept in f32
    o_ref[...] = (x * gate).astype(o_ref.dtype)                # broadcast over HW, lane-dense store


def eca_layer1(x, conv_w, kernel_size):
    """x: (B, C, H, W) NCHW. conv_w: (1, 2, kernel_size) Conv1d weight (no bias)."""
    assert kernel_size % 2 == 1, "ECA conv kernel_size must be odd ('same' padding semantics)"
    B, C, H, W = x.shape
    HW = H * W

    x_flat = x.reshape(B * C, HW)
    w_taps = conv_w.reshape(2, kernel_size).astype(jnp.float32)

    kernel = functools.partial(_eca_kernel, C=C, k=kernel_size, inv_hw=1.0 / HW)
    # Single kernel invocation: whole (B*C, HW) block in VMEM, conv taps in SMEM.
    # NOTE: at realistic ECA sizes (large C*HW) reintroduce a grid — "parallel" over batches
    # (v7x's 2 TensorCores) and HW tiles of >=512 lanes with pl.when accumulation — instead of
    # a single whole-array block.
    out_flat = pl.pallas_call(
        kernel,
        out_shape=jax.ShapeDtypeStruct((B * C, HW), x.dtype),
        in_specs=[
            pl.BlockSpec(memory_space=pltpu.MemorySpace.VMEM),   # x, whole array in VMEM
            pl.BlockSpec(memory_space=pltpu.MemorySpace.SMEM),   # 2*k conv taps as scalars
        ],
        out_specs=pl.BlockSpec(memory_space=pltpu.MemorySpace.VMEM),
    )(x_flat, w_taps)
    return out_flat.reshape(B, C, H, W)


def eca_layer1_ref(x, conv_w, kernel_size):
    """Plain-JAX reference matching the PyTorch forward exactly."""
    B, C, H, W = x.shape
    pad = (kernel_size - 1) // 2
    avg = x.mean(axis=(2, 3))                                  # (B, C)
    mx = x.max(axis=(2, 3))                                    # (B, C)
    seq = jnp.stack([avg, mx], axis=1)                         # (B, 2, C)
    seq_p = jnp.pad(seq, ((0, 0), (0, 0), (pad, pad)))
    y = jnp.zeros((B, C), x.dtype)
    for j in range(kernel_size):
        y = (y + conv_w[0, 0, j] * seq_p[:, 0, j:j + C]
               + conv_w[0, 1, j] * seq_p[:, 1, j:j + C])
    gate = jax.nn.sigmoid(y)
    return x * gate[:, :, None, None]


if __name__ == "__main__":
    kernel_size = 3
    B, C, H, W = 2, 4, 16, 16

    key = jax.random.PRNGKey(0)
    kx, kw = jax.random.split(key)
    x = jax.random.normal(kx, (B, C, H, W), dtype=jnp.float32)
    # Deterministic Conv1d(in=2, out=1, k, bias=False) weight, shape (1, 2, k).
    conv_w = jax.random.normal(kw, (1, 2, kernel_size), dtype=jnp.float32) * 0.5

    out = eca_layer1(x, conv_w, kernel_size)
    out = jax.block_until_ready(out)

    ref = eca_layer1_ref(x, conv_w, kernel_size)
    assert out.shape == x.shape
    assert jnp.allclose(out, ref, atol=1e-5, rtol=1e-5), "Pallas output mismatch vs reference"

    print("KERNEL_OK")
</pallas_src>

<mosaic_0001>
module attributes {stable_mosaic.version = 11 : i64} {
  func.func @_eca_kernel(%arg0: memref<8x256xf32, #tpu.memory_space<vmem>>, %arg1: memref<2x3xf32, #tpu.memory_space<smem>>, %arg2: memref<8x256xf32, #tpu.memory_space<vmem>>) attributes {dimension_semantics = [], scalar_prefetch = 0 : i64, scratch_operands = 0 : i64, tpu.core_type = #tpu.core_type<tc>} {
    %c0 = arith.constant 0 : index
    %c0_0 = arith.constant 0 : index
    %0 = vector.load %arg0[%c0, %c0_0] : memref<8x256xf32, #tpu.memory_space<vmem>>, vector<8x256xf32>
    %cst = arith.constant dense<0.000000e+00> : vector<8xf32>
    %1 = vector.multi_reduction <add>, %0, %cst [1] : vector<8x256xf32> to vector<8xf32>
    %2 = vector.shape_cast %1 : vector<8xf32> to vector<8x1xf32>
    %cst_1 = arith.constant 3.906250e-03 : f32
    %3 = vector.broadcast %cst_1 : f32 to vector<8x1xf32>
    %4 = arith.mulf %2, %3 : vector<8x1xf32>
    %cst_2 = arith.constant dense<0xFF800000> : vector<8xf32>
    %5 = vector.multi_reduction <maximumf>, %0, %cst_2 [1] : vector<8x256xf32> to vector<8xf32>
    %6 = vector.shape_cast %5 : vector<8xf32> to vector<8x1xf32>
    %7 = tpu.iota {dimensions = array<i32: 0>} : vector<8x1xi32>
    %c4_i32 = arith.constant 4 : i32
    %c0_i32 = arith.constant 0 : i32
    %8 = arith.cmpi eq, %c4_i32, %c0_i32 : i32
    %c1_i32 = arith.constant 1 : i32
    %9 = arith.select %8, %c1_i32, %c4_i32 : i32
    %10 = vector.broadcast %9 : i32 to vector<8x1xi32>
    %11 = arith.remsi %7, %10 : vector<8x1xi32>
    %c0_i32_3 = arith.constant 0 : i32
    %12 = vector.broadcast %c0_i32_3 : i32 to vector<8x1xi32>
    %13 = arith.cmpi ne, %11, %12 : vector<8x1xi32>
    %c0_i32_4 = arith.constant 0 : i32
    %14 = vector.broadcast %c0_i32_4 : i32 to vector<8x1xi32>
    %15 = arith.cmpi slt, %11, %14 : vector<8x1xi32>
    %c0_i32_5 = arith.constant 0 : i32
    %16 = arith.cmpi slt, %9, %c0_i32_5 : i32
    %17 = vector.broadcast %16 : i1 to vector<8x1xi1>
    %18 = vector.broadcast %17 : vector<8x1xi1> to vector<8x1xi1>
    %19 = arith.xori %15, %18 : vector<8x1xi1>
    %20 = arith.andi %19, %13 : vector<8x1xi1>
    %21 = vector.broadcast %9 : i32 to vector<8x1xi32>
    %22 = arith.addi %11, %21 : vector<8x1xi32>
    %23 = arith.select %20, %22, %11 : vector<8x1xi1>, vector<8x1xi32>
    %cst_6 = arith.constant 0.000000e+00 : f32
    %24 = vector.broadcast %cst_6 : f32 to vector<8x1xf32>
    %c0_7 = arith.constant 0 : index
    %c0_8 = arith.constant 0 : index
    %25 = memref.load %arg1[%c0_7, %c0_8] : memref<2x3xf32, #tpu.memory_space<smem>>
    %c1 = arith.constant 1 : index
    %c0_9 = arith.constant 0 : index
    %26 = memref.load %arg1[%c1, %c0_9] : memref<2x3xf32, #tpu.memory_space<smem>>
    %c1_i32_10 = arith.constant 1 : i32
    %27 = tpu.dynamic_rotate %4 by %c1_i32_10 dim 0 : vector<8x1xf32>, i32 -> vector<8x1xf32>
    %c1_i32_11 = arith.constant 1 : i32
    %28 = tpu.dynamic_rotate %6 by %c1_i32_11 dim 0 : vector<8x1xf32>, i32 -> vector<8x1xf32>
    %c-1_i32 = arith.constant -1 : i32
    %29 = vector.broadcast %c-1_i32 : i32 to vector<8x1xi32>
    %30 = arith.addi %23, %29 : vector<8x1xi32>
    %c0_i32_12 = arith.constant 0 : i32
    %31 = vector.broadcast %c0_i32_12 : i32 to vector<8x1xi32>
    %32 = arith.cmpi sge, %30, %31 : vector<8x1xi32>
    %c-1_i32_13 = arith.constant -1 : i32
    %33 = vector.broadcast %c-1_i32_13 : i32 to vector<8x1xi32>
    %34 = arith.addi %23, %33 : vector<8x1xi32>
    %c4_i32_14 = arith.constant 4 : i32
    %35 = vector.broadcast %c4_i32_14 : i32 to vector<8x1xi32>
    %36 = arith.cmpi slt, %34, %35 : vector<8x1xi32>
    %37 = arith.andi %32, %36 : vector<8x1xi1>
    %38 = vector.broadcast %25 : f32 to vector<8x1xf32>
    %39 = arith.mulf %38, %27 : vector<8x1xf32>
    %40 = vector.broadcast %26 : f32 to vector<8x1xf32>
    %41 = arith.mulf %40, %28 : vector<8x1xf32>
    %42 = arith.addf %39, %41 : vector<8x1xf32>
    %cst_15 = arith.constant 0.000000e+00 : f32
    %43 = vector.broadcast %cst_15 : f32 to vector<8x1xf32>
    %44 = arith.select %37, %42, %43 : vector<8x1xi1>, vector<8x1xf32>
    %45 = arith.addf %24, %44 : vector<8x1xf32>
    %c0_16 = arith.constant 0 : index
    %c1_17 = arith.constant 1 : index
    %46 = memref.load %arg1[%c0_16, %c1_17] : memref<2x3xf32, #tpu.memory_space<smem>>
    %c1_18 = arith.constant 1 : index
    %c1_19 = arith.constant 1 : index
    %47 = memref.load %arg1[%c1_18, %c1_19] : memref<2x3xf32, #tpu.memory_space<smem>>
    %48 = vector.broadcast %46 : f32 to vector<8x1xf32>
    %49 = arith.mulf %48, %4 : vector<8x1xf32>
    %50 = arith.addf %45, %49 : vector<8x1xf32>
    %51 = vector.broadcast %47 : f32 to vector<8x1xf32>
    %52 = arith.mulf %51, %6 : vector<8x1xf32>
    %53 = arith.addf %50, %52 : vector<8x1xf32>
    %c0_20 = arith.constant 0 : index
    %c2 = arith.constant 2 : index
    %54 = memref.load %arg1[%c0_20, %c2] : memref<2x3xf32, #tpu.memory_space<smem>>
    %c1_21 = arith.constant 1 : index
    %c2_22 = arith.constant 2 : index
    %55 = memref.load %arg1[%c1_21, %c2_22] : memref<2x3xf32, #tpu.memory_space<smem>>
    %c7_i32 = arith.constant 7 : i32
    %56 = tpu.dynamic_rotate %4 by %c7_i32 dim 0 : vector<8x1xf32>, i32 -> vector<8x1xf32>
    %c7_i32_23 = arith.constant 7 : i32
    %57 = tpu.dynamic_rotate %6 by %c7_i32_23 dim 0 : vector<8x1xf32>, i32 -> vector<8x1xf32>
    %c1_i32_24 = arith.constant 1 : i32
    %58 = vector.broadcast %c1_i32_24 : i32 to vector<8x1xi32>
    %59 = arith.addi %23, %58 : vector<8x1xi32>
    %c0_i32_25 = arith.constant 0 : i32
    %60 = vector.broadcast %c0_i32_25 : i32 to vector<8x1xi32>
    %61 = arith.cmpi sge, %59, %60 : vector<8x1xi32>
    %c1_i32_26 = arith.constant 1 : i32
    %62 = vector.broadcast %c1_i32_26 : i32 to vector<8x1xi32>
    %63 = arith.addi %23, %62 : vector<8x1xi32>
    %c4_i32_27 = arith.constant 4 : i32
    %64 = vector.broadcast %c4_i32_27 : i32 to vector<8x1xi32>
    %65 = arith.cmpi slt, %63, %64 : vector<8x1xi32>
    %66 = arith.andi %61, %65 : vector<8x1xi1>
    %67 = vector.broadcast %54 : f32 to vector<8x1xf32>
    %68 = arith.mulf %67, %56 : vector<8x1xf32>
    %69 = vector.broadcast %55 : f32 to vector<8x1xf32>
    %70 = arith.mulf %69, %57 : vector<8x1xf32>
    %71 = arith.addf %68, %70 : vector<8x1xf32>
    %cst_28 = arith.constant 0.000000e+00 : f32
    %72 = vector.broadcast %cst_28 : f32 to vector<8x1xf32>
    %73 = arith.select %66, %71, %72 : vector<8x1xi1>, vector<8x1xf32>
    %74 = arith.addf %53, %73 : vector<8x1xf32>
    %75 = arith.negf %74 : vector<8x1xf32>
    %76 = math.exp %75 : vector<8x1xf32>
    %cst_29 = arith.constant 1.000000e+00 : f32
    %77 = vector.broadcast %cst_29 : f32 to vector<8x1xf32>
    %78 = arith.addf %77, %76 : vector<8x1xf32>
    %79 = arith.divf %77, %78 : vector<8x1xf32>
    %80 = vector.broadcast %79 : vector<8x1xf32> to vector<8x256xf32>
    %81 = arith.mulf %0, %80 : vector<8x256xf32>
    %c0_30 = arith.constant 0 : index
    %c0_31 = arith.constant 0 : index
    %82 = vector.load %arg2[%c0_30, %c0_31] : memref<8x256xf32, #tpu.memory_space<vmem>>, vector<8x256xf32>
    tpu.vector_store %arg2[%c0_30, %c0_31], %81 {strides = array<i32>} : memref<8x256xf32, #tpu.memory_space<vmem>>, vector<8x256xf32>,
    return
  }
}

</mosaic_0001>

<bundles_post_ra>
// kernel: tpu_custom_call.1
= control target key start
LH: loop header
LB: loop body
LE: loop exit
PB: predicated region body
PF: predicated region fallthrough
CT: control target
= control target key end

     0   :  { %7 = vsyncpa [#allocation3], 0  ;;  %s225_s0 = inlined_call_operand.hbm [shape: f32[8,256], index: 0, kind: input, shape index: {}]   ;;  %s226_s1 = inlined_call_operand.hbm [shape: f32[2,3], index: 1, kind: input, shape index: {}]   ;;  %s227_s2 = inlined_call_operand.hbm [shape: f32[8,256], index: 2, kind: output, shape index: {}]  }
   0x1   :  { %8 = vsyncpa [#allocation5], 0 }
   0x2   :  { %9 = vsyncpa [#allocation4], 0  ;;  %s197_s9 = smov [#allocation2]  }
   0x3   :  { %s16_s10 = sshll.u32 %s197_s9, 4  ;;  %s17_s10 = int_to_ptr.vmem [resolvable:$true] %s16_s10 }
   0x4   :  { %s151_s11 = scalar_lea.vmem %s17_s10, 256  ;;  %p156_p1 = scmp.lt.s32.totalorder %s17_s10, %s17_s10 }
   0x5   :  { %p152_p0 = scmp.ne.s32.totalorder %s17_s10, %s151_s11  ;;  %p157_p2 = scmp.lt.s32.totalorder %s151_s11, %s151_s11 }
   0x7   :  { %p158_p3 = por %p157_p2, %p156_p1 }
   0x9   :  { %p159_p4 = pnand %p158_p3, %p152_p0 }
   0xb   :  { %162 = shalt.err (!%p159_p4)
}
   0xc   :  { %19 = dma.hbm_to_vmem [thread:$0]  %s225_s0, 256, %s17_s10, [#allocation3]  }
   0xd   :  { %s198_s14 = smov [#allocation6]  }
   0xe   :  { %27 = dma.hbm_to_smem %s226_s1, 32, %s198_s14, [#allocation5]  }
   0xf   :  { %191 = dma.done.wait [#allocation3], 256  }
  0x10   :  { %192 = vsyncadd [#allocation3], 4294967040 }
  0x11   :  { %193 = dma.done.wait [#allocation5], 32  }
  0x12   :  { %194 = vsyncadd [#allocation5], 4294967264 }
  0x13   :  { %34 = sfence }
  0x14   :  { %v35_v0 = vld [vmem:[#allocation2] sm:$0xff]  ;;  %v36_v1 = vld [vmem:[#allocation2 + $0x8] sm:$0xff]  ;;  %v199_v4 = vmov 0   ;;  %v44_v5 = vlaneseq  ;;  %s58_s0 = sld [smem:[#allocation6]]  ;;  %s200_s21 = smov [#allocation7]  }
  0x15   :  { %v37_v2 = vadd.f32 %v36_v1, %v35_v0  ;;  %v41_v3 = vmax.f32 %v35_v0, %v36_v1  ;;  %137 = vset.pattern.permute.xlu1 %v199_v4  ;;  %138 = vset.pattern.permute.xlu0 %v199_v4  ;;  %s127_s17 = sld [smem:[#allocation6 + $0x80]]  ;;  %s117_s22 = sshll.u32 %s200_s21, 4  ;;  %s118_s22 = int_to_ptr.vmem [resolvable:$true] %s117_s22 }
  0x16   :  { %v45_v6 = vshrl.u32 %v44_v5, 7  ;;  %s131_s18 = sld [smem:[#allocation6 + $0x82]]  ;;  %s171_s23 = scalar_lea.vmem %s118_s22, 256 }
  0x17   :  { %38 = vadd.xlane.f32.xlu0 %v37_v2  ;;  %s130_s1 = sld [smem:[#allocation6 + $0x2]]  ;;  %p172_p5 = scmp.ne.s32.totalorder %s118_s22, %s171_s23 }
  0x18   :  { %s128_s19 = sld [smem:[#allocation6 + $0x1]]  ;;  %v50_v8 = vand.u32 3, %v45_v6  ;;  %p176_p6 = scmp.lt.s32.totalorder %s118_s22, %s118_s22 }
  0x19   :  { %s129_s20 = sld [smem:[#allocation6 + $0x81]]  ;;  %p177_p7 = scmp.lt.s32.totalorder %s171_s23, %s171_s23 }
  0x1a   :  { %v66_v11 = vstv %s58_s0  ;;  %v62_v12 = vadd.s32 4294967295, %v50_v8  ;;  %v85_v23 = vadd.s32 1, %v50_v8 }
  0x1b   :  { %42 = vmax.xlane.f32.xlu0 %v41_v3  ;;  %v68_v13 = vstv %s127_s17  ;;  %p178_p8 = por %p177_p7, %p176_p6 }
  0x1c   :  { %v91_v16 = vstv %s131_s18  ;;  %vm63_vm0 = vcmp.ge.s32.totalorder %v62_v12, 0  ;;  %vm87_vm1 = vcmp.lt.s32.totalorder %v85_v23, 4 }
  0x1d   :  { %v89_v18 = vstv %s130_s1  ;;  %p179_p9 = pnand %p178_p8, %p172_p5 }
  0x1e   :  { %v75_v20 = vstv %s128_s19 }
  0x1f   :  { %v78_v26 = vstv %s129_s20 }
  0xa0   :  { %v39_v7 = vpop.xlane.xlu0 %38 }
  0xa1   :  { %v40_v9 = vmul.f32 0.00390625, %v39_v7 }
  0xa3   :  { %v60_v10 = vrot.slane %v40_v9, 7  ;;  %v83_v15 = vrot.slane %v40_v9, 1  ;;  %v76_v28 = vmul.f32 %v75_v20, %v40_v9 }
  0xa4   :  { %v43_v14 = vpop.xlane.xlu0 %42 }
  0xa5   :  { %v61_v17 = vrot.slane %v43_v14, 7  ;;  %v84_v19 = vrot.slane %v43_v14, 1  ;;  %v67_v21 = vmul.f32 %v66_v11, %v60_v10  ;;  %v90_v25 = vmul.f32 %v89_v18, %v83_v15 }
  0xa6   :  { %v79_v32 = vmul.f32 %v78_v26, %v43_v14 }
  0xa7   :  { %v69_v22 = vmul.f32 %v68_v13, %v61_v17  ;;  %v92_v24 = vmul.f32 %v91_v16, %v84_v19 }
  0xa9   :  { %v70_v27 = vadd.f32 %v69_v22, %v67_v21  ;;  %v93_v30 = vadd.f32 %v92_v24, %v90_v25 }
  0xab   :  { %v71_v29 = vsel %vm63_vm0, %v70_v27, 0.0  ;;  %v94_v34 = vsel %vm87_vm1, %v93_v30, 0.0 }
  0xac   :  { %v77_v31 = vadd.f32 %v76_v28, %v71_v29 }
  0xae   :  { %v80_v33 = vadd.f32 %v79_v32, %v77_v31 }
  0xb0   :  { %v95_v35 = vadd.f32 %v94_v34, %v80_v33 }
  0xb2   :  { %v132_v36 = vmul.f32 -1.442695, %v95_v35 }
  0xb4   :  { %139 = vpow2.f32 %v132_v36 }
  0xc1   :  { %v140_v37 = vpop.eup %139 }
  0xc2   :  { %v99_v38 = vadd.f32 1.0, %v140_v37 }
  0xc4   :  { %141 = vrcp.f32 %v99_v38 }
  0xd1   :  { %v142_v39 = vpop.eup %141 }
  0xd2   :  { %104 = vperm.xlu1 %137, %v142_v39  }
 0x14d   :  { %v105_v40 = vpop.permute.xlu1 %104 }
 0x14e   :  { %v107_v41 = vmul.f32 %v105_v40, %v35_v0  ;;  %v108_v42 = vmul.f32 %v105_v40, %v36_v1 }
 0x150   :  { %109 = vst [vmem:[#allocation7] sm:$0xff] %v107_v41  ;;  %110 = vst [vmem:[#allocation7 + $0x8] sm:$0xff] %v108_v42 }
 0x151   :  { %182 = shalt.err (!%p179_p9)
}
 0x152   :  { %120 = dma.vmem_to_hbm [thread:$0]  %s118_s22, 256, %s227_s2, [#allocation4]  }
 0x153   :  { %195 = dma.done.wait [#allocation4], 256  }
 0x154   :  { %196 = vsyncadd [#allocation4], 4294967040 }
 0x155   :  { %124 = vsyncpa [#allocation3], 1 }
 0x156   :  { %125 = vsyncpa [#allocation4], 1 }
 0x157   :  { %126 = vsyncpa [#allocation5], 1 }

</bundles_post_ra>
